<compile_context>
chip_gen: v7x
topology: tpu7x:2x2x1
jax: 0.10.0
libtpu: 0.0.40
codegen_flags: <defaults>
</compile_context>

<pallas_src>
import functools

import numpy as np
import jax
import jax.numpy as jnp
from jax.experimental import pallas as pl
from jax.experimental.pallas import tpu as pltpu


# ----------------------------- glue / setup ---------------------------------

def linear_space(backcast_length, forecast_length, is_forecast=True):
    horizon = forecast_length if is_forecast else backcast_length
    return np.arange(0, horizon) / horizon


def squeeze_last_dim(x):
    if x.ndim == 3 and x.shape[-1] == 1:
        return x[..., 0]
    return x


def make_trend_basis(thetas_dim, backcast_length, forecast_length):
    assert thetas_dim <= 4, "thetas_dim is too big."
    t_b = linear_space(backcast_length, forecast_length, is_forecast=False)
    t_f = linear_space(backcast_length, forecast_length, is_forecast=True)
    T_b = np.stack([t_b ** i for i in range(thetas_dim)]).astype(np.float32)
    T_f = np.stack([t_f ** i for i in range(thetas_dim)]).astype(np.float32)
    return jnp.asarray(T_b), jnp.asarray(T_f)


def init_params(key, units, thetas_dim, backcast_length):
    """Deterministic synthetic parameter init (shapes match the nn.Module)."""
    ks = jax.random.split(key, 9)

    def lin(k, fan_in, fan_out, with_bias=True):
        bound = 1.0 / np.sqrt(fan_in)
        w = jax.random.uniform(k, (fan_in, fan_out), jnp.float32, -bound, bound)
        if not with_bias:
            return w, None
        b = jax.random.uniform(jax.random.fold_in(k, 1), (1, fan_out),
                               jnp.float32, -bound, bound)
        return w, b

    w1, b1 = lin(ks[0], backcast_length, units)
    w2, b2 = lin(ks[1], units, units)
    w3, b3 = lin(ks[2], units, units)
    w4, b4 = lin(ks[3], units, units)
    # share_thetas=True -> theta_b_fc is theta_f_fc (single bias-free linear)
    wt, _ = lin(ks[4], units, thetas_dim, with_bias=False)
    return dict(w1=w1, b1=b1, w2=w2, b2=b2, w3=w3, b3=b3, w4=w4, b4=b4, wt=wt)


# ------------------------------ Pallas kernel --------------------------------

def trend_block_kernel(xT_ref, w1T_ref, w234T_ref, b_ref, woutT_ref,
                       bcT_ref, fcT_ref, *, backcast_len):
    # xT:    (L, tb)         bf16, lane-dense batch tile
    # w1T:   (units, L)      bf16
    # w234T: (3, units, units) bf16
    # b:     (4, units, 1)   f32
    # woutT: (out_len, units) f32  (folded theta-fc @ [T_b | T_f], transposed)
    x = xT_ref[...]
    h = jnp.dot(w1T_ref[...], x, preferred_element_type=jnp.float32)
    h = jnp.maximum(h + b_ref[0], 0.0).astype(jnp.bfloat16)
    for i in range(3):
        y = jnp.dot(w234T_ref[i], h, preferred_element_type=jnp.float32)
        h = jnp.maximum(y + b_ref[i + 1], 0.0).astype(jnp.bfloat16)
    # Final folded projection kept in f32 (K=units; cost negligible).
    out = jnp.dot(woutT_ref[...], h.astype(jnp.float32),
                  preferred_element_type=jnp.float32)        # (out_len, tb)
    bcT_ref[...] = out[:backcast_len]
    fcT_ref[...] = out[backcast_len:]


# ------------------------------ wrapper ---------------------------------------

def _cdiv(a, b):
    return -(-a // b)


def _round_up(n, m):
    return _cdiv(n, m) * m


def _choose_batch_tile(B, tb_max=1024, lane=128):
    """Batch tile on the 128-lane axis; pad waste bounded by nt*lane."""
    b_lane = _round_up(max(B, 1), lane)
    nt = _cdiv(b_lane, max(lane, tb_max))
    # Guarantee >= 2 grid steps when there is enough work so v7x's second
    # TensorCore participates ("parallel" axis). No-op on v5e/v6e.
    if nt == 1 and b_lane >= 2 * lane:
        nt = 2
    tb = _round_up(_cdiv(b_lane, nt), lane)
    return tb, nt * tb, nt


def trend_block_forward(x, params, T_b, T_f, *, tb_max=1024):
    x = squeeze_last_dim(x)
    B, L = x.shape
    backcast_len = T_b.shape[1]
    forecast_len = T_f.shape[1]
    assert L == backcast_len
    units = params["w1"].shape[1]
    out_len = backcast_len + forecast_len
    bf16 = jnp.bfloat16

    # Offline algebraic fold of the shared bias-free theta fc into the basis;
    # kept in f32 for tighter agreement with the reference.
    w_out_T = jnp.dot(params["wt"],
                      jnp.concatenate([T_b, T_f], axis=1)).T           # (out_len, units)

    w1_T = params["w1"].T.astype(bf16)                                  # (units, L)
    w234_T = jnp.stack([params["w2"].T, params["w3"].T,
                        params["w4"].T]).astype(bf16)                   # (3, units, units)
    biases = jnp.stack([jnp.reshape(params[k], (units, 1))
                        for k in ("b1", "b2", "b3", "b4")])             # (4, units, 1) f32

    tb, b_pad, nt = _choose_batch_tile(B, tb_max)

    # One fused wrapper pass over x: transpose + bf16 cast + lane pad.
    x_T = jnp.pad(x.T.astype(bf16), ((0, 0), (0, b_pad - B)))           # (L, b_pad)

    full = lambda shape: pl.BlockSpec(shape, lambda i, _s=shape: (0,) * len(_s))

    bcT, fcT = pl.pallas_call(
        functools.partial(trend_block_kernel, backcast_len=backcast_len),
        out_shape=(jax.ShapeDtypeStruct((backcast_len, b_pad), jnp.float32),
                   jax.ShapeDtypeStruct((forecast_len, b_pad), jnp.float32)),
        grid=(nt,),
        in_specs=[
            pl.BlockSpec((L, tb), lambda i: (0, i)),   # x^T (batch-tiled on lanes)
            full((units, L)),                          # fc1 weight^T
            full((3, units, units)),                   # fc2..fc4 weights^T (stacked)
            full((4, units, 1)),                       # biases (stacked, column vectors)
            full((out_len, units)),                    # folded theta@basis, transposed
        ],
        out_specs=(pl.BlockSpec((backcast_len, tb), lambda i: (0, i)),
                   pl.BlockSpec((forecast_len, tb), lambda i: (0, i))),
        compiler_params=pltpu.CompilerParams(
            dimension_semantics=("parallel",)),
    )(x_T, w1_T, w234_T, biases, w_out_T)

    backcast = bcT[:, :B].T
    forecast = fcT[:, :B].T
    return backcast, forecast


# ------------------------------ reference ------------------------------------

def trend_block_ref(x, params, T_b, T_f):
    """Unfused reference with the same bf16 weight / f32 accumulate numerics."""
    x = squeeze_last_dim(x).astype(jnp.bfloat16)

    def layer(h, w, b):
        y = jnp.dot(h, w.astype(jnp.bfloat16),
                    preferred_element_type=jnp.float32) + b
        return jax.nn.relu(y).astype(jnp.bfloat16)

    h = layer(x, params["w1"], params["b1"])
    h = layer(h, params["w2"], params["b2"])
    h = layer(h, params["w3"], params["b3"])
    h = layer(h, params["w4"], params["b4"])
    theta = jnp.dot(h, params["wt"].astype(jnp.bfloat16),
                    preferred_element_type=jnp.float32)
    return theta @ T_b, theta @ T_f


# ------------------------------ main -----------------------------------------

if __name__ == "__main__":
    units = 32
    thetas_dim = 4
    backcast_length = 10
    forecast_length = 5
    batch = 2

    key = jax.random.PRNGKey(0)
    k_params, k_x = jax.random.split(key)

    params = init_params(k_params, units, thetas_dim, backcast_length)
    T_b, T_f = make_trend_basis(thetas_dim, backcast_length, forecast_length)

    # input shaped (B, backcast_length, 1) to exercise squeeze_last_dim
    x = jax.random.normal(k_x, (batch, backcast_length, 1), jnp.float32)

    backcast, forecast = trend_block_forward(x, params, T_b, T_f)
    jax.block_until_ready((backcast, forecast))

    bc_ref, fc_ref = trend_block_ref(x, params, T_b, T_f)
    assert backcast.shape == (batch, backcast_length)
    assert forecast.shape == (batch, forecast_length)
    # bf16 weights/activations + folded basis -> loose (bf16-level) tolerance
    np.testing.assert_allclose(np.asarray(backcast), np.asarray(bc_ref),
                               rtol=1e-2, atol=1e-2)
    np.testing.assert_allclose(np.asarray(forecast), np.asarray(fc_ref),
                               rtol=1e-2, atol=1e-2)

    print("KERNEL_OK")
</pallas_src>

<mosaic_0001>
module attributes {stable_mosaic.version = 11 : i64} {
  func.func @trend_block_kernel(%arg0: i32, %arg1: memref<10x128xbf16, #tpu.memory_space<vmem>>, %arg2: memref<32x10xbf16, #tpu.memory_space<vmem>>, %arg3: memref<3x32x32xbf16, #tpu.memory_space<vmem>>, %arg4: memref<4x32x1xf32, #tpu.memory_space<vmem>>, %arg5: memref<15x32xf32, #tpu.memory_space<vmem>>, %arg6: memref<10x128xf32, #tpu.memory_space<vmem>>, %arg7: memref<5x128xf32, #tpu.memory_space<vmem>>) attributes {dimension_semantics = [#tpu.dimension_semantics<parallel>], iteration_bounds = array<i64: 1>, scalar_prefetch = 0 : i64, scratch_operands = 0 : i64, tpu.core_type = #tpu.core_type<tc>, window_params = [{transform_indices = @transform_0, window_bounds = array<i64: 10, 128>}, {pipeline_mode = #tpu.pipeline_mode<synchronous>, transform_indices = @transform_1, window_bounds = array<i64: 32, 10>}, {pipeline_mode = #tpu.pipeline_mode<synchronous>, transform_indices = @transform_2, window_bounds = array<i64: 3, 32, 32>}, {pipeline_mode = #tpu.pipeline_mode<synchronous>, transform_indices = @transform_3, window_bounds = array<i64: 4, 32, 1>}, {pipeline_mode = #tpu.pipeline_mode<synchronous>, transform_indices = @transform_4, window_bounds = array<i64: 15, 32>}, {transform_indices = @transform_5, window_bounds = array<i64: 10, 128>}, {transform_indices = @transform_6, window_bounds = array<i64: 5, 128>}]} {
    %c0 = arith.constant 0 : index
    %c0_0 = arith.constant 0 : index
    %0 = vector.load %arg1[%c0, %c0_0] : memref<10x128xbf16, #tpu.memory_space<vmem>>, vector<10x128xbf16>
    %c0_1 = arith.constant 0 : index
    %c0_2 = arith.constant 0 : index
    %1 = vector.load %arg2[%c0_1, %c0_2] : memref<32x10xbf16, #tpu.memory_space<vmem>>, vector<32x10xbf16>
    %cst = arith.constant dense<0.000000e+00> : vector<32x128xf32>
    %2 = tpu.matmul %1, %0, %cst {dimension_numbers = #tpu.dot_dimension_numbers<[1], [0], [0], [1], [0, 0, 1, 1], [], []>} : vector<32x10xbf16>, vector<10x128xbf16>, vector<32x128xf32> -> vector<32x128xf32>
    %c0_3 = arith.constant 0 : index
    %c0_4 = arith.constant 0 : index
    %c0_5 = arith.constant 0 : index
    %3 = vector.load %arg4[%c0_3, %c0_4, %c0_5] : memref<4x32x1xf32, #tpu.memory_space<vmem>>, vector<1x32x1xf32>
    %4 = vector.shape_cast %3 : vector<1x32x1xf32> to vector<32x1xf32>
    %5 = vector.broadcast %4 : vector<32x1xf32> to vector<32x128xf32>
    %6 = arith.addf %2, %5 : vector<32x128xf32>
    %cst_6 = arith.constant 0.000000e+00 : f32
    %7 = vector.broadcast %cst_6 : f32 to vector<32x128xf32>
    %8 = arith.maximumf %6, %7 : vector<32x128xf32>
    %9 = arith.truncf %8 : vector<32x128xf32> to vector<32x128xbf16>
    %c0_7 = arith.constant 0 : index
    %c0_8 = arith.constant 0 : index
    %c0_9 = arith.constant 0 : index
    %10 = vector.load %arg3[%c0_7, %c0_8, %c0_9] : memref<3x32x32xbf16, #tpu.memory_space<vmem>>, vector<1x32x32xbf16>
    %11 = vector.shape_cast %10 : vector<1x32x32xbf16> to vector<32x32xbf16>
    %cst_10 = arith.constant dense<0.000000e+00> : vector<32x128xf32>
    %12 = tpu.matmul %11, %9, %cst_10 {dimension_numbers = #tpu.dot_dimension_numbers<[1], [0], [0], [1], [0, 0, 1, 1], [], []>} : vector<32x32xbf16>, vector<32x128xbf16>, vector<32x128xf32> -> vector<32x128xf32>
    %c1 = arith.constant 1 : index
    %c0_11 = arith.constant 0 : index
    %c0_12 = arith.constant 0 : index
    %13 = vector.load %arg4[%c1, %c0_11, %c0_12] : memref<4x32x1xf32, #tpu.memory_space<vmem>>, vector<1x32x1xf32>
    %14 = vector.shape_cast %13 : vector<1x32x1xf32> to vector<32x1xf32>
    %15 = vector.broadcast %14 : vector<32x1xf32> to vector<32x128xf32>
    %16 = arith.addf %12, %15 : vector<32x128xf32>
    %cst_13 = arith.constant 0.000000e+00 : f32
    %17 = vector.broadcast %cst_13 : f32 to vector<32x128xf32>
    %18 = arith.maximumf %16, %17 : vector<32x128xf32>
    %19 = arith.truncf %18 : vector<32x128xf32> to vector<32x128xbf16>
    %c1_14 = arith.constant 1 : index
    %c0_15 = arith.constant 0 : index
    %c0_16 = arith.constant 0 : index
    %20 = vector.load %arg3[%c1_14, %c0_15, %c0_16] : memref<3x32x32xbf16, #tpu.memory_space<vmem>>, vector<1x32x32xbf16>
    %21 = vector.shape_cast %20 : vector<1x32x32xbf16> to vector<32x32xbf16>
    %cst_17 = arith.constant dense<0.000000e+00> : vector<32x128xf32>
    %22 = tpu.matmul %21, %19, %cst_17 {dimension_numbers = #tpu.dot_dimension_numbers<[1], [0], [0], [1], [0, 0, 1, 1], [], []>} : vector<32x32xbf16>, vector<32x128xbf16>, vector<32x128xf32> -> vector<32x128xf32>
    %c2 = arith.constant 2 : index
    %c0_18 = arith.constant 0 : index
    %c0_19 = arith.constant 0 : index
    %23 = vector.load %arg4[%c2, %c0_18, %c0_19] : memref<4x32x1xf32, #tpu.memory_space<vmem>>, vector<1x32x1xf32>
    %24 = vector.shape_cast %23 : vector<1x32x1xf32> to vector<32x1xf32>
    %25 = vector.broadcast %24 : vector<32x1xf32> to vector<32x128xf32>
    %26 = arith.addf %22, %25 : vector<32x128xf32>
    %cst_20 = arith.constant 0.000000e+00 : f32
    %27 = vector.broadcast %cst_20 : f32 to vector<32x128xf32>
    %28 = arith.maximumf %26, %27 : vector<32x128xf32>
    %29 = arith.truncf %28 : vector<32x128xf32> to vector<32x128xbf16>
    %c2_21 = arith.constant 2 : index
    %c0_22 = arith.constant 0 : index
    %c0_23 = arith.constant 0 : index
    %30 = vector.load %arg3[%c2_21, %c0_22, %c0_23] : memref<3x32x32xbf16, #tpu.memory_space<vmem>>, vector<1x32x32xbf16>
    %31 = vector.shape_cast %30 : vector<1x32x32xbf16> to vector<32x32xbf16>
    %cst_24 = arith.constant dense<0.000000e+00> : vector<32x128xf32>
    %32 = tpu.matmul %31, %29, %cst_24 {dimension_numbers = #tpu.dot_dimension_numbers<[1], [0], [0], [1], [0, 0, 1, 1], [], []>} : vector<32x32xbf16>, vector<32x128xbf16>, vector<32x128xf32> -> vector<32x128xf32>
    %c3 = arith.constant 3 : index
    %c0_25 = arith.constant 0 : index
    %c0_26 = arith.constant 0 : index
    %33 = vector.load %arg4[%c3, %c0_25, %c0_26] : memref<4x32x1xf32, #tpu.memory_space<vmem>>, vector<1x32x1xf32>
    %34 = vector.shape_cast %33 : vector<1x32x1xf32> to vector<32x1xf32>
    %35 = vector.broadcast %34 : vector<32x1xf32> to vector<32x128xf32>
    %36 = arith.addf %32, %35 : vector<32x128xf32>
    %cst_27 = arith.constant 0.000000e+00 : f32
    %37 = vector.broadcast %cst_27 : f32 to vector<32x128xf32>
    %38 = arith.maximumf %36, %37 : vector<32x128xf32>
    %39 = arith.truncf %38 : vector<32x128xf32> to vector<32x128xbf16>
    %c0_28 = arith.constant 0 : index
    %c0_29 = arith.constant 0 : index
    %40 = vector.load %arg5[%c0_28, %c0_29] : memref<15x32xf32, #tpu.memory_space<vmem>>, vector<15x32xf32>
    %41 = arith.extf %39 : vector<32x128xbf16> to vector<32x128xf32>
    %cst_30 = arith.constant dense<0.000000e+00> : vector<15x128xf32>
    %42 = tpu.matmul %40, %41, %cst_30 {dimension_numbers = #tpu.dot_dimension_numbers<[1], [0], [0], [1], [0, 0, 1, 1], [], []>} : vector<15x32xf32>, vector<32x128xf32>, vector<15x128xf32> -> vector<15x128xf32>
    %43 = vector.extract_strided_slice %42 {offsets = [0, 0], sizes = [10, 128], strides = [1, 1]} : vector<15x128xf32> to vector<10x128xf32>
    %c0_31 = arith.constant 0 : index
    %c0_32 = arith.constant 0 : index
    %44 = vector.load %arg6[%c0_31, %c0_32] : memref<10x128xf32, #tpu.memory_space<vmem>>, vector<10x128xf32>
    tpu.vector_store %arg6[%c0_31, %c0_32], %43 {strides = array<i32>} : memref<10x128xf32, #tpu.memory_space<vmem>>, vector<10x128xf32>,
    %45 = vector.extract_strided_slice %42 {offsets = [10, 0], sizes = [5, 128], strides = [1, 1]} : vector<15x128xf32> to vector<5x128xf32>
    %c0_33 = arith.constant 0 : index
    %c0_34 = arith.constant 0 : index
    %46 = vector.load %arg7[%c0_33, %c0_34] : memref<5x128xf32, #tpu.memory_space<vmem>>, vector<5x128xf32>
    tpu.vector_store %arg7[%c0_33, %c0_34], %45 {strides = array<i32>} : memref<5x128xf32, #tpu.memory_space<vmem>>, vector<5x128xf32>,
    return
  }
  func.func @transform_0(%arg0: i32) -> (i32, i32) {
    %c0_i32 = arith.constant 0 : i32
    %c0_i32_0 = arith.constant 0 : i32
    return %c0_i32, %arg0 : i32, i32
  }
  func.func @transform_1(%arg0: i32) -> (i32, i32) {
    %c0_i32 = arith.constant 0 : i32
    %c0_i32_0 = arith.constant 0 : i32
    %c0_i32_1 = arith.constant 0 : i32
    return %c0_i32, %c0_i32_0 : i32, i32
  }
  func.func @transform_2(%arg0: i32) -> (i32, i32, i32) {
    %c0_i32 = arith.constant 0 : i32
    %c0_i32_0 = arith.constant 0 : i32
    %c0_i32_1 = arith.constant 0 : i32
    %c0_i32_2 = arith.constant 0 : i32
    return %c0_i32, %c0_i32_0, %c0_i32_1 : i32, i32, i32
  }
  func.func @transform_3(%arg0: i32) -> (i32, i32, i32) {
    %c0_i32 = arith.constant 0 : i32
    %c0_i32_0 = arith.constant 0 : i32
    %c0_i32_1 = arith.constant 0 : i32
    %c0_i32_2 = arith.constant 0 : i32
    return %c0_i32, %c0_i32_0, %c0_i32_1 : i32, i32, i32
  }
  func.func @transform_4(%arg0: i32) -> (i32, i32) {
    %c0_i32 = arith.constant 0 : i32
    %c0_i32_0 = arith.constant 0 : i32
    %c0_i32_1 = arith.constant 0 : i32
    return %c0_i32, %c0_i32_0 : i32, i32
  }
  func.func @transform_5(%arg0: i32) -> (i32, i32) {
    %c0_i32 = arith.constant 0 : i32
    %c0_i32_0 = arith.constant 0 : i32
    return %c0_i32, %arg0 : i32, i32
  }
  func.func @transform_6(%arg0: i32) -> (i32, i32) {
    %c0_i32 = arith.constant 0 : i32
    %c0_i32_0 = arith.constant 0 : i32
    return %c0_i32, %arg0 : i32, i32
  }
}

</mosaic_0001>

<bundles_post_ra>
// kernel: tpu_custom_call.1
= control target key start
LH: loop header
LB: loop body
LE: loop exit
PB: predicated region body
PF: predicated region fallthrough
CT: control target
= control target key end

     0   :  { %12 = vsyncpa [#allocation3], 0  ;;  %vm77_vm0 = vcmask 1044480   ;;  %vm70_vm1 = vcmask 80896   ;;  %v733_v6 = vmov 0   ;;  %s893_s0 = inlined_call_operand.vmem [shape: bf16[10,128], index: 0, kind: input, shape index: {}]   ;;  %s894_s1 = inlined_call_operand.vmem [shape: bf16[32,10], index: 1, kind: input, shape index: {}]   ;;  %s895_s2 = inlined_call_operand.vmem [shape: bf16[3,32,32], index: 2, kind: input, shape index: {}]   ;;  %s896_s3 = inlined_call_operand.vmem [shape: f32[4,32,1], index: 3, kind: input, shape index: {}]   ;;  %s897_s4 = inlined_call_operand.vmem [shape: f32[15,32], index: 4, kind: input, shape index: {}]   ;;  %s898_s5 = inlined_call_operand.hbm [shape: f32[10,128], index: 5, kind: output, shape index: {0}]   ;;  %s899_s6 = inlined_call_operand.hbm [shape: f32[5,128], index: 6, kind: output, shape index: {1}]  }
   0x1   :  { %v676_v0 = vld [vmem:[%s893_s0] sm:$0x1f]   ;;  %v678_v3 = vld [vmem:[%s894_s1 + $0x8] sm:$0xff]   ;;  %v33_v5 = vld [vmem:[%s896_s3 + $0x10] sm:$0xff]  ;;  %674 = vset.pattern.permute.xlu0 %v733_v6  ;;  %675 = vset.pattern.permute.xlu1 %v733_v6 }
   0x2   :  { %v677_v1 = vld [vmem:[%s894_s1] sm:$0xff]   ;;  %668 = vmatprep.subr.msk.bf16.mxu0 %vm77_vm0, %v676_v0  ;;  %v79_v2 = vsel %vm77_vm0, %v676_v0, 0  ;;  %47 = vperm.xlu1 %675, %v33_v5   ;;  %v32_v7 = vld [vmem:[%s896_s3 + $0x8] sm:$0xff]  ;;  %v34_v8 = vld [vmem:[%s896_s3 + $0x18] sm:$0xff] }
   0x3   :  { %620 = vmatpush3.bf16.msra.mxu0 %v79_v2  ;;  %621 = vmatprep.mubr.msk.bf16.mxu0 %vm70_vm1, %v677_v1  ;;  %v31_v4 = vld [vmem:[%s896_s3] sm:$0xff]  ;;  %v565_v10 = vld [vmem:[%s896_s3 + $0x28] sm:$0xff] }
   0x4   :  { %37 = vperm.xlu0 %674, %v31_v4   ;;  %v564_v9 = vld [vmem:[%s896_s3 + $0x20] sm:$0xff] }
   0x6   :  { %622 = vmatmul.mubr.msk.bf16.vlgmr.msra.gmra.mrb[0].mxu0 %vm70_vm1, %v678_v3  ;;  %52 = vperm.xlu1 %675, %v34_v8  }
   0x8   :  { %42 = vperm.xlu0 %674, %v32_v7  }
   0x9   :  { %13 = vsyncpa [#allocation5], 0  ;;  %v566_v11 = vld [vmem:[%s896_s3 + $0x30] sm:$0xff]  ;;  %v567_v12 = vld [vmem:[%s896_s3 + $0x38] sm:$0xff]  ;;  %vm175_vm2 = vcmask 261120   ;;  %s734_s21 = smov [#allocation2]  }
   0xa   :  { %152 = vperm.xlu1 %675, %v565_v10   ;;  %v576_v13 = vld [vmem:[%s896_s3 + $0x40] sm:$0xff]  ;;  %v577_v14 = vld [vmem:[%s896_s3 + $0x48] sm:$0xff]  ;;  %v578_v15 = vld [vmem:[%s896_s3 + $0x50] sm:$0xff]  ;;  %s534_s22 = sshll.u32 %s734_s21, 4  ;;  %s735_s23 = smov [#allocation4]   ;;  %s862_s22 = int_to_ptr.vmem [resolvable:$true] %s534_s22 }
   0xb   :  { %v579_v16 = vld [vmem:[%s896_s3 + $0x58] sm:$0xff]  ;;  %v588_v17 = vld [vmem:[%s896_s3 + $0x60] sm:$0xff]  ;;  %v589_v18 = vld [vmem:[%s896_s3 + $0x68] sm:$0xff]  ;;  %s547_s24 = sshll.u32 %s735_s23, 4  ;;  %s548_s24 = int_to_ptr.vmem [resolvable:$true] %s547_s24 }
   0xc   :  { %147 = vperm.xlu0 %674, %v564_v9   ;;  %v590_v19 = vld [vmem:[%s896_s3 + $0x70] sm:$0xff]  ;;  %v591_v20 = vld [vmem:[%s896_s3 + $0x78] sm:$0xff]  ;;  %v679_v21 = vld [vmem:[%s895_s2] sm:$0xff]   ;;  %s685_s25 = scalar_lea.vmem %s548_s24, 128  ;;  %p690_p1 = scmp.lt.s32.totalorder %s548_s24, %s548_s24 }
   0xd   :  { %629 = vmatprep.mubr.msk.bf16.mxu1 %vm175_vm2, %v679_v21  ;;  %v680_v40 = vld [vmem:[%s895_s2 + $0x8] sm:$0xff]   ;;  %v681_v41 = vld [vmem:[%s895_s2 + $0x10] sm:$0xff]   ;;  %v682_v60 = vld [vmem:[%s895_s2 + $0x18] sm:$0xff]   ;;  %p686_p0 = scmp.ne.s32.totalorder %s548_s24, %s685_s25  ;;  %p691_p2 = scmp.lt.s32.totalorder %s685_s25, %s685_s25 }
   0xe   :  { %162 = vperm.xlu1 %675, %v567_v12   ;;  %637 = vmatprep.mubr.msk.bf16.mxu0 %vm175_vm2, %v681_v41  ;;  %v683_v61 = vld [vmem:[%s895_s2 + $0x20] sm:$0xff]  }
   0xf   :  { %p692_p3 = por %p691_p2, %p690_p1 }
  0x10   :  { %157 = vperm.xlu0 %674, %v566_v11  }
  0x11   :  { %p693_p4 = pnand %p692_p3, %p686_p0 }
  0x12   :  { %254 = vperm.xlu1 %675, %v577_v14  }
  0x14   :  { %249 = vperm.xlu0 %674, %v576_v13  }
  0x16   :  { %264 = vperm.xlu1 %675, %v579_v16   ;;  %v684_v16 = vld [vmem:[%s895_s2 + $0x28] sm:$0xff]  }
  0x18   :  { %259 = vperm.xlu0 %674, %v578_v15  }
  0x1a   :  { %355 = vperm.xlu1 %675, %v589_v18  }
  0x1c   :  { %350 = vperm.xlu0 %674, %v588_v17   ;;  %v439_v17 = vld [vmem:[%s897_s4] sm:$0xff] }
  0x1e   :  { %365 = vperm.xlu1 %675, %v591_v20  }
  0x20   :  { %360 = vperm.xlu0 %674, %v590_v19  }
  0x81   :  { %v48_v22 = vpop.permute.xlu1 %47 }
  0x83   :  { %v38_v23 = vpop.permute.xlu0 %37 }
  0x85   :  { %v53_v27 = vpop.permute.xlu1 %52 }
  0x87   :  { %v43_v30 = vpop.permute.xlu0 %42 }
  0x89   :  { %v153_v43 = vpop.permute.xlu1 %152 }
  0x8b   :  { %v148_v42 = vpop.permute.xlu0 %147 }
  0x8d   :  { %v163_v48 = vpop.permute.xlu1 %162 }
  0x8f   :  { %v158_v44 = vpop.permute.xlu0 %157 }
  0x91   :  { %v255_v63 = vpop.permute.xlu1 %254 }
  0x93   :  { %v250_v62 = vpop.permute.xlu0 %249 }
  0x95   :  { %v265_v4 = vpop.permute.xlu1 %264 }
  0x97   :  { %v260_v0 = vpop.permute.xlu0 %259 }
  0x99   :  { %v356_v19 = vpop.permute.xlu1 %355 }
  0x9b   :  { %v351_v18 = vpop.permute.xlu0 %350 }
  0x9f   :  { %v361_v20 = vpop.permute.xlu0 %360 }
  0xd9   :  { %v623_v24 = vpop.f32.mrb[0].mxu0 }
  0xda   :  { %v124_v25 = vadd.f32 %v623_v24, %v48_v22  ;;  %v115_v26 = vpop.f32.mrb[1].mxu0  ;;  %v366_v24 = vpop.permute.xlu1 %365 }
  0xdb   :  { %v116_v28 = vadd.f32 %v115_v26, %v38_v23  ;;  %v624_v29 = vpop.f32.mrb[2].mxu0 }
  0xdc   :  { %v127_v31 = vadd.f32 %v624_v29, %v53_v27  ;;  %v118_v32 = vpop.f32.mrb[3].mxu0  ;;  %v132_v34 = vmax.f32 %v124_v25, 0.0 }
  0xdd   :  { %v119_v33 = vadd.f32 %v118_v32, %v43_v30  ;;  %v130_v36 = vmax.f32 %v116_v28, 0.0 }
  0xde   :  { %v133_v35 = vmax.f32 %v127_v31, 0.0 }
  0xdf   :  { %v131_v37 = vmax.f32 %v119_v33, 0.0 }
  0xe0   :  { %v135_v38 = vpack.c.bf16 %v133_v35, %v132_v34 }
  0xe1   :  { %v134_v39 = vpack.c.bf16 %v131_v37, %v130_v36  ;;  %v440_v36 = vld [vmem:[%s897_s4 + $0x8] sm:$0x7f] }
  0xe3   :  { %625 = vmatprep.subr.bf16.mxu1 %v134_v39 }
  0xe4   :  { %626 = vmatpush3.bf16.msra.mxu1 %v134_v39 }
  0xe5   :  { %627 = vmatprep.subr.bf16.mxu1 %v135_v38 }
  0xe8   :  { %628 = vmatpush3.bf16.msra.mxu1 %v135_v38 }
  0xeb   :  { %630 = vmatmul.mubr.msk.bf16.vlgmr.msra.gmra.mrb[0].mxu1 %vm175_vm2, %v680_v40 }
  0xec   :  { %645 = vmatprep.mubr.msk.bf16.mxu1 %vm175_vm2, %v683_v61 }
 0x1be   :  { %v631_v45 = vpop.f32.mrb[0].mxu1 }
 0x1bf   :  { %v225_v46 = vadd.f32 %v631_v45, %v158_v44  ;;  %v216_v47 = vpop.f32.mrb[1].mxu1 }
 0x1c0   :  { %v217_v49 = vadd.f32 %v216_v47, %v148_v42  ;;  %v632_v50 = vpop.f32.mrb[2].mxu1 }
 0x1c1   :  { %v228_v51 = vadd.f32 %v632_v50, %v163_v48  ;;  %v219_v52 = vpop.f32.mrb[3].mxu1  ;;  %v233_v54 = vmax.f32 %v225_v46, 0.0 }
 0x1c2   :  { %v220_v53 = vadd.f32 %v219_v52, %v153_v43  ;;  %v231_v56 = vmax.f32 %v217_v49, 0.0 }
 0x1c3   :  { %v234_v55 = vmax.f32 %v228_v51, 0.0 }
 0x1c4   :  { %v232_v57 = vmax.f32 %v220_v53, 0.0 }
 0x1c5   :  { %v236_v58 = vpack.c.bf16 %v234_v55, %v233_v54 }
 0x1c6   :  { %v235_v59 = vpack.c.bf16 %v232_v57, %v231_v56 }
 0x1c8   :  { %633 = vmatprep.subr.bf16.mxu0 %v235_v59 }
 0x1c9   :  { %634 = vmatpush3.bf16.msra.mxu0 %v235_v59 }
 0x1ca   :  { %635 = vmatprep.subr.bf16.mxu0 %v236_v58 }
 0x1cd   :  { %636 = vmatpush3.bf16.msra.mxu0 %v236_v58 }
 0x1d0   :  { %638 = vmatmul.mubr.msk.bf16.vlgmr.msra.gmra.mrb[4].mxu0 %vm175_vm2, %v682_v60 }
 0x1d1   :  { %657 = vmatprep.mubr.msk.f32.mxu0 %vm175_vm2, %v439_v17 }
 0x2a3   :  { %v639_v1 = vpop.f32.mrb[4].mxu0 }
 0x2a4   :  { %v326_v2 = vadd.f32 %v639_v1, %v260_v0  ;;  %v317_v3 = vpop.f32.mrb[5].mxu0 }
 0x2a5   :  { %v318_v5 = vadd.f32 %v317_v3, %v250_v62  ;;  %v640_v6 = vpop.f32.mrb[6].mxu0 }
 0x2a6   :  { %v329_v7 = vadd.f32 %v640_v6, %v265_v4  ;;  %v320_v8 = vpop.f32.mrb[7].mxu0  ;;  %v334_v10 = vmax.f32 %v326_v2, 0.0 }
 0x2a7   :  { %v321_v9 = vadd.f32 %v320_v8, %v255_v63  ;;  %v332_v12 = vmax.f32 %v318_v5, 0.0 }
 0x2a8   :  { %v335_v11 = vmax.f32 %v329_v7, 0.0 }
 0x2a9   :  { %v333_v13 = vmax.f32 %v321_v9, 0.0 }
 0x2aa   :  { %v337_v14 = vpack.c.bf16 %v335_v11, %v334_v10 }
 0x2ab   :  { %v336_v15 = vpack.c.bf16 %v333_v13, %v332_v12 }
 0x2ad   :  { %641 = vmatprep.subr.bf16.mxu1 %v336_v15 }
 0x2ae   :  { %642 = vmatpush3.bf16.msra.mxu1 %v336_v15 }
 0x2af   :  { %643 = vmatprep.subr.bf16.mxu1 %v337_v14 }
 0x2b2   :  { %644 = vmatpush3.bf16.msra.mxu1 %v337_v14 }
 0x2b5   :  { %646 = vmatmul.mubr.msk.bf16.vlgmr.msra.gmra.mrb[4].mxu1 %vm175_vm2, %v684_v16 }
 0x388   :  { %v647_v21 = vpop.f32.mrb[4].mxu1 }
 0x389   :  { %v427_v22 = vadd.f32 %v647_v21, %v361_v20  ;;  %v418_v23 = vpop.f32.mrb[5].mxu1 }
 0x38a   :  { %v419_v25 = vadd.f32 %v418_v23, %v351_v18  ;;  %v648_v26 = vpop.f32.mrb[6].mxu1 }
 0x38b   :  { %v430_v27 = vadd.f32 %v648_v26, %v366_v24  ;;  %v421_v28 = vpop.f32.mrb[7].mxu1  ;;  %v435_v30 = vmax.f32 %v427_v22, 0.0 }
 0x38c   :  { %v422_v29 = vadd.f32 %v421_v28, %v356_v19  ;;  %v433_v32 = vmax.f32 %v419_v25, 0.0 }
 0x38d   :  { %v436_v31 = vmax.f32 %v430_v27, 0.0 }
 0x38e   :  { %v434_v33 = vmax.f32 %v422_v29, 0.0 }
 0x38f   :  { %v438_v34 = vpack.c.bf16 %v436_v31, %v435_v30 }
 0x390   :  { %v437_v35 = vpack.c.bf16 %v434_v33, %v433_v32 }
 0x392   :  { %661 = vmatprep.subr.bf16.mxu0 %v437_v35 }
 0x393   :  { %663 = vmatpush3.bf16.msra.mxu0 %v437_v35 }
 0x394   :  { %665 = vmatprep.subr.bf16.mxu0 %v438_v34 }
 0x397   :  { %667 = vmatpush3.bf16.msra.mxu0 %v438_v34 }
 0x39a   :  { %658 = vmatmul.mubr.msk.f32.vlgmr.msra.gmra.mrb[8].mxu0 %vm175_vm2, %v440_v36 }
 0x46d   :  { %v659_v37 = vpop.f32.mrb[8].mxu0 }
 0x46e   :  { %527 = vst [vmem:[#allocation2 + $0x8] sm:$0x3] %v659_v37  ;;  %528 = vst [vmem:[#allocation4 - $0x2] sm:$0x7c] %v659_v37  ;;  %v517_v38 = vpop.f32.mrb[9].mxu0 }
 0x46f   :  { %526 = vst [vmem:[#allocation2] sm:$0xff] %v517_v38 }
 0x470   :  { %696 = shalt.err (!%p693_p4)
}
 0x471   :  { %s697_s27 = scalar_lea.hbm %s899_s6, 128 }
 0x472   :  { %p698_p5 = scmp.ne.s32.totalorder %s899_s6, %s697_s27  ;;  %p701_p6 = scmp.lt.u32.totalorder %s697_s27, %s899_s6 }
 0x474   :  { %p703_p7 = pnand %p701_p6, %p698_p5 }
 0x476   :  { %706 = shalt.err (!%p703_p7)
}
 0x477   :  { %550 = dma.vmem_to_hbm [thread:$0]  %s548_s24, 128, %s899_s6, [#allocation5]  }
 0x478   :  { %s707_s1 = scalar_lea.vmem %s862_s22, 256  ;;  %p712_p9 = scmp.lt.s32.totalorder %s862_s22, %s862_s22 }
 0x479   :  { %p708_p8 = scmp.ne.s32.totalorder %s862_s22, %s707_s1  ;;  %p713_p10 = scmp.lt.s32.totalorder %s707_s1, %s707_s1 }
 0x47b   :  { %p714_p11 = por %p713_p10, %p712_p9 }
 0x47d   :  { %p715_p12 = pnand %p714_p11, %p708_p8 }
 0x47f   :  { %718 = shalt.err (!%p715_p12)
}
 0x480   :  { %s719_s10 = scalar_lea.hbm %s898_s5, 256 }
 0x481   :  { %p720_p13 = scmp.ne.s32.totalorder %s898_s5, %s719_s10  ;;  %p723_p0 = scmp.lt.u32.totalorder %s719_s10, %s898_s5 }
 0x483   :  { %p725_p1 = pnand %p723_p0, %p720_p13 }
 0x485   :  { %728 = shalt.err (!%p725_p1)
}
 0x486   :  { %s736_s6 = smov 128   ;;  %s737_s15 = smov 8  }
 0x487   :  { %540 = dma.vmem_to_hbm [thread:$0]  %s862_s22, 256, %s898_s5, [#allocation3], %s736_s6, %s736_s6, %s737_s15  }
 0x488   :  { %729 = dma.done.wait [#allocation3], 256  }
 0x489   :  { %730 = vsyncadd [#allocation3], 4294967040 }
 0x48a   :  { %731 = dma.done.wait [#allocation5], 128  }
 0x48b   :  { %732 = vsyncadd [#allocation5], 4294967168 }
 0x48c   :  { %557 = vsyncpa [#allocation3], 1 }
 0x48d   :  { %558 = vsyncpa [#allocation5], 1 }

</bundles_post_ra>
